<compile_context>
chip_gen: v6e
topology: v6e:2x2x1
jax: 0.10.0
libtpu: 0.0.40
codegen_flags: <defaults>
</compile_context>

<pallas_src>
import functools
import math

import numpy as np
import jax
import jax.numpy as jnp
from jax.experimental import pallas as pl
from jax.experimental.pallas import tpu as pltpu


LANE = 128  # TPU lane width; each batch's vocab block is padded to this.


# ---------------------------------------------------------------------------
# Sinusoid positional encoding table (same as get_sinusoid_encoding_table).
# ---------------------------------------------------------------------------
def get_sinusoid_encoding_table(n_position, d_hid, cls_token=False):
    def get_position_angle_vec(position):
        return [position / np.power(10000, 2 * (hid_j // 2) / d_hid)
                for hid_j in range(d_hid)]

    table = np.array([get_position_angle_vec(p) for p in range(n_position)],
                     dtype=np.float64)
    table[:, 0::2] = np.sin(table[:, 0::2])
    table[:, 1::2] = np.cos(table[:, 1::2])
    if cls_token:
        table = np.concatenate([np.zeros((1, d_hid)), table], axis=0)
    return table.astype(np.float32)


# ---------------------------------------------------------------------------
# One-time parameter prep (do NOT redo this per forward call):
#   * bf16 casts of all matmul weights,
#   * vocab dim padded to a full 128-lane tile (zeros -> padded logits are 0),
#   * bottleneck bias folded into the (N, H) positional table.
# ---------------------------------------------------------------------------
def prepare_decoder_params(params, pos):
    bf16 = jnp.bfloat16
    H, V = params["w3"].shape
    Vp = ((V + LANE - 1) // LANE) * LANE
    w3p = jnp.zeros((H, Vp), jnp.float32).at[:, :V].set(params["w3"])
    b3p = jnp.zeros((1, Vp), jnp.float32).at[:, :V].set(params["b3"])
    prepped = {
        "wb": params["wb"].astype(bf16),
        "w1": params["w1"].astype(bf16),
        "w2": params["w2"].astype(bf16),
        "w3": w3p.astype(bf16),
        "b1": params["b1"],
        "b2": params["b2"],
        "b3": b3p,
        "posb": pos + params["bb"],      # (N, H) f32, bottleneck bias folded in
    }
    return jax.device_put(prepped)


# ---------------------------------------------------------------------------
# Fused Pallas head: bottleneck -> (+ pos, bias folded) -> vocab_embed MLP,
# sequence-first output fused into a lane-aligned store.
# ---------------------------------------------------------------------------
@functools.partial(jax.jit, static_argnames=("vocab",))
def nlmtrack_forward_decoder(x, prepped, *, vocab):
    """x: (B, N, 480) neck feature; returns (N, B, vocab) like the torch path."""
    B, N, Cin = x.shape
    H = prepped["wb"].shape[1]
    Vp = prepped["w3"].shape[1]
    bf16 = jnp.bfloat16
    x_bf = x.astype(bf16)                                  # only per-call prep

    def kernel(x_ref, posb_ref, wb_ref, w1_ref, b1_ref, w2_ref, b2_ref,
               w3_ref, b3_ref, out_ref):
        posb = posb_ref[...]
        wb = wb_ref[...]
        w1 = w1_ref[...]
        w2 = w2_ref[...]
        w3 = w3_ref[...]
        b1 = b1_ref[...]
        b2 = b2_ref[...]
        b3 = b3_ref[...]
        # Static unroll over the (small) batch.  This keeps posb at (N, H)
        # (no per-batch tiling) and fuses the (B, N, V) -> (N, B, V)
        # sequence-first transpose into the store: batch b lands in the fully
        # aligned 128-lane block [b*Vp, (b+1)*Vp) -> unmasked vst, no rotate.
        for b in range(B):
            # bottleneck nn.Linear(480, H); bias pre-folded into posb.
            h = jnp.dot(x_ref[b], wb,
                        preferred_element_type=jnp.float32) + posb
            # TODO(synk): real externally-injected transformer decoder goes
            # here; stubbed as memory + positional encoding.
            # vocab_embed MLP(H, H, bins+2, 3): bf16 operands at the dots,
            # f32 accumulate, bias/ReLU in f32 (v5e has no bf16 VPU path).
            h = jnp.maximum(
                jnp.dot(h.astype(bf16), w1,
                        preferred_element_type=jnp.float32) + b1, 0.0)
            h = jnp.maximum(
                jnp.dot(h.astype(bf16), w2,
                        preferred_element_type=jnp.float32) + b2, 0.0)
            o = jnp.dot(h.astype(bf16), w3,
                        preferred_element_type=jnp.float32) + b3   # (N, Vp)
            out_ref[:, b * Vp:(b + 1) * Vp] = o

    flops = 2 * B * N * (Cin * H + 2 * H * H + H * Vp)
    bytes_accessed = (B * N * Cin * 2 + N * H * 4                    # x, posb
                      + (Cin * H + 2 * H * H + H * Vp) * 2           # bf16 weights
                      + (2 * H + Vp) * 4                             # biases
                      + N * B * Vp * 4)                              # output

    vmem_spec = pl.BlockSpec(memory_space=pltpu.MemorySpace.VMEM)
    out = pl.pallas_call(
        kernel,
        out_shape=jax.ShapeDtypeStruct((N, B * Vp), jnp.float32),
        in_specs=[vmem_spec] * 9,
        out_specs=vmem_spec,
        cost_estimate=pl.CostEstimate(flops=flops, transcendentals=0,
                                      bytes_accessed=bytes_accessed),
    )(x_bf, prepped["posb"], prepped["wb"], prepped["w1"], prepped["b1"],
      prepped["w2"], prepped["b2"], prepped["w3"], prepped["b3"])

    # Free metadata-only reshape (already sequence-first), then strip lane pad.
    return out.reshape(N, B, Vp)[:, :, :vocab]


def nlmtrack_forward_neck_glue(zx_last, num_patch_x, num_frames=1):
    """forward_neck reshape glue: (B, N_total, C) -> (B, C, s, s)."""
    zx = zx_last[:, -num_patch_x * num_frames:]
    B, N, C = zx.shape
    s = math.isqrt(N)
    assert s * s == N, f"token count {N} is not a perfect square"
    zx = jnp.transpose(zx, (0, 2, 1)).reshape(B, C, s, s)
    # TODO(synk): neck is an externally-injected module; only the glue is done.
    return zx


# ---------------------------------------------------------------------------
# Deterministic parameter init (trunc_normal approximated by normal * 0.02).
# ---------------------------------------------------------------------------
def init_params(key, c_in, hidden, vocab):
    ks = jax.random.split(key, 4)
    std = 0.02
    return {
        "wb": jax.random.normal(ks[0], (c_in, hidden), jnp.float32) * std,
        "bb": jnp.zeros((1, hidden), jnp.float32),
        "w1": jax.random.normal(ks[1], (hidden, hidden), jnp.float32) * std,
        "b1": jnp.zeros((1, hidden), jnp.float32),
        "w2": jax.random.normal(ks[2], (hidden, hidden), jnp.float32) * std,
        "b2": jnp.zeros((1, hidden), jnp.float32),
        "w3": jax.random.normal(ks[3], (hidden, vocab), jnp.float32) * std,
        "b3": jnp.zeros((1, vocab), jnp.float32),
    }


def reference_forward_decoder(x, pos, p):
    """Pure-JAX reference with the same bf16 operand / f32 accumulate recipe."""
    bf = jnp.bfloat16
    h = jnp.dot(x.astype(bf), p["wb"].astype(bf),
                preferred_element_type=jnp.float32) + (pos[None, :, :] + p["bb"])
    h = jnp.maximum(jnp.dot(h.astype(bf), p["w1"].astype(bf),
                            preferred_element_type=jnp.float32) + p["b1"], 0.0)
    h = jnp.maximum(jnp.dot(h.astype(bf), p["w2"].astype(bf),
                            preferred_element_type=jnp.float32) + p["b2"], 0.0)
    o = jnp.dot(h.astype(bf), p["w3"].astype(bf),
                preferred_element_type=jnp.float32) + p["b3"]
    return jnp.transpose(o, (1, 0, 2))


if __name__ == "__main__":
    # Small shapes consistent with the module:
    B = 2
    num_patch_x = 16          # side_fx = 4
    num_frames = 1
    C_in = 480                # bottleneck input dim (fixed in the module)
    hidden_dim = 32
    bins = 30                 # vocab = bins + 2 = 32
    vocab = bins + 2
    num_patches = num_patch_x * num_frames   # feature_type == 'x'

    key = jax.random.PRNGKey(0)
    k_x, k_p = jax.random.split(key)

    # neck output feature entering forward_decoder: (B, N, 480)
    x = jax.random.normal(k_x, (B, num_patches, C_in), jnp.float32)
    params = init_params(k_p, C_in, hidden_dim, vocab)

    # fixed sinusoid pos_embed (num_patches, hidden_dim)
    pos = jnp.asarray(get_sinusoid_encoding_table(num_patches, hidden_dim))

    # One-time prep (bf16 weights, vocab lane padding, pos+bias fold).
    prepped = prepare_decoder_params(params, pos)

    out = nlmtrack_forward_decoder(x, prepped, vocab=vocab)
    out = jax.block_until_ready(out)

    ref = reference_forward_decoder(x, pos, params)
    assert out.shape == (num_patches, B, vocab)
    np.testing.assert_allclose(np.asarray(out), np.asarray(ref),
                               rtol=1e-2, atol=1e-3)

    # exercise the forward_neck reshape glue too
    zx_last = jax.random.normal(key, (B, num_patches, hidden_dim), jnp.float32)
    neck_in = jax.block_until_ready(
        nlmtrack_forward_neck_glue(zx_last, num_patch_x, num_frames))
    assert neck_in.shape == (B, hidden_dim, 4, 4)

    print("KERNEL_OK")
</pallas_src>

<mosaic_0001>
module attributes {stable_mosaic.version = 11 : i64} {
  func.func @kernel(%arg0: memref<2x16x480xbf16, #tpu.memory_space<vmem>>, %arg1: memref<16x32xf32, #tpu.memory_space<vmem>>, %arg2: memref<480x32xbf16, #tpu.memory_space<vmem>>, %arg3: memref<32x32xbf16, #tpu.memory_space<vmem>>, %arg4: memref<1x32xf32, #tpu.memory_space<vmem>>, %arg5: memref<32x32xbf16, #tpu.memory_space<vmem>>, %arg6: memref<1x32xf32, #tpu.memory_space<vmem>>, %arg7: memref<32x128xbf16, #tpu.memory_space<vmem>>, %arg8: memref<1x128xf32, #tpu.memory_space<vmem>>, %arg9: memref<16x256xf32, #tpu.memory_space<vmem>>) attributes {dimension_semantics = [], scalar_prefetch = 0 : i64, scratch_operands = 0 : i64, tpu.core_type = #tpu.core_type<tc>} {
    %c0 = arith.constant 0 : index
    %c0_0 = arith.constant 0 : index
    %0 = vector.load %arg1[%c0, %c0_0] : memref<16x32xf32, #tpu.memory_space<vmem>>, vector<16x32xf32>
    %c0_1 = arith.constant 0 : index
    %c0_2 = arith.constant 0 : index
    %1 = vector.load %arg2[%c0_1, %c0_2] : memref<480x32xbf16, #tpu.memory_space<vmem>>, vector<480x32xbf16>
    %c0_3 = arith.constant 0 : index
    %c0_4 = arith.constant 0 : index
    %2 = vector.load %arg3[%c0_3, %c0_4] : memref<32x32xbf16, #tpu.memory_space<vmem>>, vector<32x32xbf16>
    %c0_5 = arith.constant 0 : index
    %c0_6 = arith.constant 0 : index
    %3 = vector.load %arg5[%c0_5, %c0_6] : memref<32x32xbf16, #tpu.memory_space<vmem>>, vector<32x32xbf16>
    %c0_7 = arith.constant 0 : index
    %c0_8 = arith.constant 0 : index
    %4 = vector.load %arg7[%c0_7, %c0_8] : memref<32x128xbf16, #tpu.memory_space<vmem>>, vector<32x128xbf16>
    %c0_9 = arith.constant 0 : index
    %c0_10 = arith.constant 0 : index
    %5 = vector.load %arg4[%c0_9, %c0_10] : memref<1x32xf32, #tpu.memory_space<vmem>>, vector<1x32xf32>
    %c0_11 = arith.constant 0 : index
    %c0_12 = arith.constant 0 : index
    %6 = vector.load %arg6[%c0_11, %c0_12] : memref<1x32xf32, #tpu.memory_space<vmem>>, vector<1x32xf32>
    %c0_13 = arith.constant 0 : index
    %c0_14 = arith.constant 0 : index
    %7 = vector.load %arg8[%c0_13, %c0_14] : memref<1x128xf32, #tpu.memory_space<vmem>>, vector<1x128xf32>
    %c0_15 = arith.constant 0 : index
    %c0_16 = arith.constant 0 : index
    %c0_17 = arith.constant 0 : index
    %8 = vector.load %arg0[%c0_15, %c0_16, %c0_17] : memref<2x16x480xbf16, #tpu.memory_space<vmem>>, vector<1x16x480xbf16>
    %9 = vector.shape_cast %8 : vector<1x16x480xbf16> to vector<16x480xbf16>
    %cst = arith.constant dense<0.000000e+00> : vector<16x32xf32>
    %10 = tpu.matmul %9, %1, %cst {dimension_numbers = #tpu.dot_dimension_numbers<[1], [0], [0], [1], [0, 0, 1, 1], [], []>} : vector<16x480xbf16>, vector<480x32xbf16>, vector<16x32xf32> -> vector<16x32xf32>
    %11 = arith.addf %10, %0 : vector<16x32xf32>
    %12 = arith.truncf %11 : vector<16x32xf32> to vector<16x32xbf16>
    %cst_18 = arith.constant dense<0.000000e+00> : vector<16x32xf32>
    %13 = tpu.matmul %12, %2, %cst_18 {dimension_numbers = #tpu.dot_dimension_numbers<[1], [0], [0], [1], [0, 0, 1, 1], [], []>} : vector<16x32xbf16>, vector<32x32xbf16>, vector<16x32xf32> -> vector<16x32xf32>
    %14 = vector.broadcast %5 : vector<1x32xf32> to vector<16x32xf32>
    %15 = arith.addf %13, %14 : vector<16x32xf32>
    %cst_19 = arith.constant 0.000000e+00 : f32
    %16 = vector.broadcast %cst_19 : f32 to vector<16x32xf32>
    %17 = arith.maximumf %15, %16 : vector<16x32xf32>
    %18 = arith.truncf %17 : vector<16x32xf32> to vector<16x32xbf16>
    %cst_20 = arith.constant dense<0.000000e+00> : vector<16x32xf32>
    %19 = tpu.matmul %18, %3, %cst_20 {dimension_numbers = #tpu.dot_dimension_numbers<[1], [0], [0], [1], [0, 0, 1, 1], [], []>} : vector<16x32xbf16>, vector<32x32xbf16>, vector<16x32xf32> -> vector<16x32xf32>
    %20 = vector.broadcast %6 : vector<1x32xf32> to vector<16x32xf32>
    %21 = arith.addf %19, %20 : vector<16x32xf32>
    %cst_21 = arith.constant 0.000000e+00 : f32
    %22 = vector.broadcast %cst_21 : f32 to vector<16x32xf32>
    %23 = arith.maximumf %21, %22 : vector<16x32xf32>
    %24 = arith.truncf %23 : vector<16x32xf32> to vector<16x32xbf16>
    %cst_22 = arith.constant dense<0.000000e+00> : vector<16x128xf32>
    %25 = tpu.matmul %24, %4, %cst_22 {dimension_numbers = #tpu.dot_dimension_numbers<[1], [0], [0], [1], [0, 0, 1, 1], [], []>} : vector<16x32xbf16>, vector<32x128xbf16>, vector<16x128xf32> -> vector<16x128xf32>
    %26 = vector.broadcast %7 : vector<1x128xf32> to vector<16x128xf32>
    %27 = arith.addf %25, %26 : vector<16x128xf32>
    %c0_23 = arith.constant 0 : index
    %c0_24 = arith.constant 0 : index
    %28 = vector.load %arg9[%c0_23, %c0_24] : memref<16x256xf32, #tpu.memory_space<vmem>>, vector<16x128xf32>
    tpu.vector_store %arg9[%c0_23, %c0_24], %27 {strides = array<i32>} : memref<16x256xf32, #tpu.memory_space<vmem>>, vector<16x128xf32>,
    %c1 = arith.constant 1 : index
    %c0_25 = arith.constant 0 : index
    %c0_26 = arith.constant 0 : index
    %29 = vector.load %arg0[%c1, %c0_25, %c0_26] : memref<2x16x480xbf16, #tpu.memory_space<vmem>>, vector<1x16x480xbf16>
    %30 = vector.shape_cast %29 : vector<1x16x480xbf16> to vector<16x480xbf16>
    %cst_27 = arith.constant dense<0.000000e+00> : vector<16x32xf32>
    %31 = tpu.matmul %30, %1, %cst_27 {dimension_numbers = #tpu.dot_dimension_numbers<[1], [0], [0], [1], [0, 0, 1, 1], [], []>} : vector<16x480xbf16>, vector<480x32xbf16>, vector<16x32xf32> -> vector<16x32xf32>
    %32 = arith.addf %31, %0 : vector<16x32xf32>
    %33 = arith.truncf %32 : vector<16x32xf32> to vector<16x32xbf16>
    %cst_28 = arith.constant dense<0.000000e+00> : vector<16x32xf32>
    %34 = tpu.matmul %33, %2, %cst_28 {dimension_numbers = #tpu.dot_dimension_numbers<[1], [0], [0], [1], [0, 0, 1, 1], [], []>} : vector<16x32xbf16>, vector<32x32xbf16>, vector<16x32xf32> -> vector<16x32xf32>
    %35 = vector.broadcast %5 : vector<1x32xf32> to vector<16x32xf32>
    %36 = arith.addf %34, %35 : vector<16x32xf32>
    %cst_29 = arith.constant 0.000000e+00 : f32
    %37 = vector.broadcast %cst_29 : f32 to vector<16x32xf32>
    %38 = arith.maximumf %36, %37 : vector<16x32xf32>
    %39 = arith.truncf %38 : vector<16x32xf32> to vector<16x32xbf16>
    %cst_30 = arith.constant dense<0.000000e+00> : vector<16x32xf32>
    %40 = tpu.matmul %39, %3, %cst_30 {dimension_numbers = #tpu.dot_dimension_numbers<[1], [0], [0], [1], [0, 0, 1, 1], [], []>} : vector<16x32xbf16>, vector<32x32xbf16>, vector<16x32xf32> -> vector<16x32xf32>
    %41 = vector.broadcast %6 : vector<1x32xf32> to vector<16x32xf32>
    %42 = arith.addf %40, %41 : vector<16x32xf32>
    %cst_31 = arith.constant 0.000000e+00 : f32
    %43 = vector.broadcast %cst_31 : f32 to vector<16x32xf32>
    %44 = arith.maximumf %42, %43 : vector<16x32xf32>
    %45 = arith.truncf %44 : vector<16x32xf32> to vector<16x32xbf16>
    %cst_32 = arith.constant dense<0.000000e+00> : vector<16x128xf32>
    %46 = tpu.matmul %45, %4, %cst_32 {dimension_numbers = #tpu.dot_dimension_numbers<[1], [0], [0], [1], [0, 0, 1, 1], [], []>} : vector<16x32xbf16>, vector<32x128xbf16>, vector<16x128xf32> -> vector<16x128xf32>
    %47 = vector.broadcast %7 : vector<1x128xf32> to vector<16x128xf32>
    %48 = arith.addf %46, %47 : vector<16x128xf32>
    %c0_33 = arith.constant 0 : index
    %c128 = arith.constant 128 : index
    %49 = vector.load %arg9[%c0_33, %c128] : memref<16x256xf32, #tpu.memory_space<vmem>>, vector<16x128xf32>
    tpu.vector_store %arg9[%c0_33, %c128], %48 {strides = array<i32>} : memref<16x256xf32, #tpu.memory_space<vmem>>, vector<16x128xf32>,
    return
  }
}

</mosaic_0001>

<bundles_post_ra>
// kernel: nlmtrack_forward_decoder.1
= control target key start
LH: loop header
LB: loop body
LE: loop exit
PB: predicated region body
PF: predicated region fallthrough
CT: control target
= control target key end

     0   :  { %v1069_v0 = vmov 0   ;;  %vm313_vm0 = vcmask 785408   ;;  %v1070_v36 = vmov 0.0   ;;  %vm1071_vm1 = vmmov 0   ;;  %s1473_s2 = inlined_call_operand.vmem [shape: bf16[480,32], index: 2, kind: input, shape index: {}]   ;;  %s1474_s0 = inlined_call_operand.vmem [shape: bf16[2,16,480], index: 0, kind: input, shape index: {}]   ;;  %s1475_s3 = inlined_call_operand.vmem [shape: bf16[32,32], index: 3, kind: input, shape index: {}]   ;;  %s1476_s1 = inlined_call_operand.vmem [shape: f32[16,32], index: 1, kind: input, shape index: {}]   ;;  %s1477_s5 = inlined_call_operand.vmem [shape: bf16[32,32], index: 5, kind: input, shape index: {}]   ;;  %s1478_s4 = inlined_call_operand.vmem [shape: f32[1,32], index: 4, kind: input, shape index: {}]   ;;  %s1479_s7 = inlined_call_operand.vmem [shape: bf16[32,128], index: 7, kind: input, shape index: {}]   ;;  %s1480_s6 = inlined_call_operand.vmem [shape: f32[1,32], index: 6, kind: input, shape index: {}]   ;;  %s1481_s8 = inlined_call_operand.vmem [shape: f32[1,128], index: 8, kind: input, shape index: {}]   ;;  %s1482_s9 = inlined_call_operand.vmem [shape: f32[16,256], index: 9, kind: output, shape index: {}]  }
   0x1   :  { %358 = vmatprep.subr.bf16.mxu1 %v1069_v0  ;;  %v1126_v1 = vld [vmem:[%s1473_s2 + $0xb8] sm:$0xff]   ;;  %v1132_v2 = vld [vmem:[%s1473_s2 + $0xb0] sm:$0xff]   ;;  %v1148_v5 = vld [vmem:[%s1473_s2 + $0xa8] sm:$0xff]   ;;  %vm418_vm2 = vcmask 261120  }
   0x2   :  { %359 = vmatpush1.bf16.msra.mxu1 %v1126_v1  ;;  %v1138_v3 = vld [vmem:[%s1473_s2 + $0x78] sm:$0xff]   ;;  %v1156_v6 = vld [vmem:[%s1473_s2 + $0x70] sm:$0xff]   ;;  %v1167_v8 = vld [vmem:[%s1473_s2 + $0xa0] sm:$0xff]  }
   0x3   :  { %360 = vmatprep.subr.bf16.mxu1 %v1069_v0  ;;  %v1143_v4 = vld [vmem:[%s1473_s2 + $0x38] sm:$0xff]   ;;  %908 = vmatprep.subr.bf16.mxu0 %v1138_v3  ;;  %v1162_v7 = vld [vmem:[%s1473_s2 + $0x30] sm:$0xff]   ;;  %v1173_v9 = vld [vmem:[%s1473_s2 + $0x68] sm:$0xff]  }
   0x4   :  { %909 = vmatpush3.bf16.msra.mxu0 %v1143_v4  ;;  %v1180_v10 = vld [vmem:[%s1473_s2 + $0x28] sm:$0xff]   ;;  %v1187_v11 = vld [vmem:[%s1473_s2 + $0x60] sm:$0xff]   ;;  %v1192_v12 = vld [vmem:[%s1473_s2 + $0x98] sm:$0xff]  }
   0x5   :  { %910 = vmatprep.subr.bf16.mxu0 %v1156_v6  ;;  %v1199_v13 = vld [vmem:[%s1473_s2 + $0x20] sm:$0xff]   ;;  %v1206_v14 = vld [vmem:[%s1473_s2 + $0x58] sm:$0xff]   ;;  %v1211_v15 = vld [vmem:[%s1473_s2 + $0x90] sm:$0xff]  }
   0x6   :  { %361 = vmatpush1.bf16.msra.mxu1 %v1132_v2  ;;  %v1218_v16 = vld [vmem:[%s1473_s2 + $0x18] sm:$0xff]   ;;  %v1225_v17 = vld [vmem:[%s1473_s2 + $0x50] sm:$0xff]   ;;  %v1035_v18 = vld [vmem:[%s1473_s2 + $0x88] sm:$0xff]  }
   0x7   :  { %362 = vmatprep.subr.bf16.mxu1 %v1069_v0  ;;  %v1235_v19 = vld [vmem:[%s1473_s2 + $0x10] sm:$0xff]   ;;  %v1242_v20 = vld [vmem:[%s1473_s2 + $0x48] sm:$0xff]   ;;  %v1038_v21 = vld [vmem:[%s1473_s2 + $0x80] sm:$0xff]  }
   0x8   :  { %911 = vmatpush3.bf16.msra.mxu0 %v1162_v7  ;;  %v1251_v22 = vld [vmem:[%s1473_s2 + $0x8] sm:$0xff]   ;;  %v1258_v23 = vld [vmem:[%s1473_s2 + $0x40] sm:$0xff]   ;;  %v1047_v30 = vld [vmem:[%s1473_s2 + $0xd8] sm:$0xff]  }
   0x9   :  { %912 = vmatprep.subr.bf16.mxu0 %v1173_v9  ;;  %v1050_v24 = vld [vmem:[%s1474_s0 + $0x4] ss:$16 sps:$4 sm:$0xff]   ;;  %v1041_v25 = vld [vmem:[%s1473_s2 + $0xe8] sm:$0xff]   ;;  %v1048_v27 = vld [vmem:[%s1474_s0] ss:$16 sps:$4 sm:$0xff]  }
   0xa   :  { %363 = vmatpush1.bf16.msra.mxu1 %v1148_v5  ;;  %v1270_v26 = vld [vmem:[%s1473_s2] sm:$0xff]   ;;  %349 = vmatprep.mubr.bf16.mxu0 %v1050_v24  ;;  %v1056_v28 = vld [vmem:[%s1474_s0 + $0xc] ss:$16 sps:$4 sm:$0xff]   ;;  %v1051_v31 = vld [vmem:[%s1473_s2 + $0xd0] sm:$0xff]  }
   0xb   :  { %364 = vmatprep.subr.bf16.mxu1 %v1069_v0  ;;  %v1044_v29 = vld [vmem:[%s1473_s2 + $0xe0] sm:$0xff]   ;;  %883 = vmatprep.mubr.msk.bf16.mxu1 %vm313_vm0, %v1056_v28  ;;  %v1052_v32 = vld [vmem:[%s1473_s2 + $0xc8] sm:$0xff]  }
   0xc   :  { %913 = vmatpush3.bf16.msra.mxu0 %v1180_v10  ;;  %v1053_v33 = vld [vmem:[%s1473_s2 + $0xc0] sm:$0xff]   ;;  %v1054_v34 = vld [vmem:[%s1474_s0 + $0x8] ss:$16 sps:$4 sm:$0xff]  }
   0xd   :  { %914 = vmatprep.subr.bf16.mxu0 %v1187_v11  ;;  %v1328_v35 = vld [vmem:[%s1475_s3 + $0x8] sm:$0xff]   ;;  %v1336_v37 = vld [vmem:[%s1475_s3] sm:$0xff]  }
   0xe   :  { %365 = vmatpush1.bf16.msra.mxu1 %v1167_v8  ;;  %v1345_v44 = vld [vmem:[%s1476_s1] sm:$0xff]  ;;  %v1350_v46 = vld [vmem:[%s1476_s1 + $0x8] sm:$0xff] }
   0xf   :  { %366 = vmatprep.subr.bf16.mxu1 %v1069_v0  ;;  %v1360_v55 = vld [vmem:[%s1477_s5 + $0x8] sm:$0xff]   ;;  %v1367_v56 = vld [vmem:[%s1477_s5] sm:$0xff]  }
  0x10   :  { %915 = vmatpush3.bf16.msra.mxu0 %v1199_v13  ;;  %v1374_v57 = vld [vmem:[%s1478_s4] ss:$0 sm:$0xff] }
  0x11   :  { %916 = vmatprep.subr.bf16.mxu0 %v1206_v14 }
  0x12   :  { %367 = vmatpush1.bf16.msra.mxu1 %v1192_v12 }
  0x13   :  { %368 = vmatprep.subr.bf16.mxu1 %v1069_v0 }
  0x14   :  { %917 = vmatpush3.bf16.msra.mxu0 %v1218_v16 }
  0x15   :  { %918 = vmatprep.subr.bf16.mxu0 %v1225_v17 }
  0x16   :  { %369 = vmatpush1.bf16.msra.mxu1 %v1211_v15 }
  0x17   :  { %370 = vmatprep.subr.bf16.mxu1 %v1069_v0 }
  0x18   :  { %919 = vmatpush3.bf16.msra.mxu0 %v1235_v19 }
  0x19   :  { %920 = vmatprep.subr.bf16.mxu0 %v1242_v20 }
  0x1a   :  { %371 = vmatpush1.bf16.msra.mxu1 %v1035_v18 }
  0x1b   :  { %372 = vmatprep.subr.bf16.mxu1 %v1069_v0 }
  0x1c   :  { %921 = vmatpush3.bf16.msra.mxu0 %v1251_v22 }
  0x1d   :  { %922 = vmatprep.subr.bf16.mxu0 %v1258_v23 }
  0x1e   :  { %373 = vmatpush1.bf16.msra.mxu1 %v1038_v21 }
  0x1f   :  { %378 = vmatprep.subr.bf16.mxu1 %v1069_v0 }
  0x20   :  { %923 = vmatpush3.bf16.msra.mxu0 %v1270_v26 }
  0x21   :  { %970 = vmatprep.subr.bf16.mxu0 %v1070_v36 }
  0x22   :  { %379 = vmatpush2.bf16.msra.mxu1 %v1041_v25 }
  0x23   :  { %380 = vmatprep.subr.bf16.mxu1 %v1069_v0  ;;  %350 = vmatmul.mubr.bf16.vlgmr.msra.gmra.mxu0 %v1048_v27 }
  0x24   :  { %971 = vmatpush3.bf16.msra.mxu0 %v1328_v35  ;;  %974 = vmatprep.mubr.msk.bf16.mxu0 %vm1071_vm1, %v1070_v36 }
  0x25   :  { %972 = vmatprep.subr.bf16.mxu0 %v1070_v36 }
  0x26   :  { %381 = vmatpush2.bf16.msra.mxu1 %v1044_v29 }
  0x27   :  { %382 = vmatprep.subr.bf16.mxu1 %v1069_v0 }
  0x28   :  { %973 = vmatpush3.bf16.msra.mxu0 %v1336_v37 }
  0x29   :  { %978 = vmatprep.subr.bf16.mxu0 %v1070_v36 }
  0x2a   :  { %383 = vmatpush2.bf16.msra.mxu1 %v1047_v30 }
  0x2b   :  { %384 = vmatprep.subr.bf16.mxu1 %v1069_v0 }
  0x2e   :  { %385 = vmatpush2.bf16.msra.mxu1 %v1051_v31 }
  0x2f   :  { %386 = vmatprep.subr.bf16.mxu1 %v1069_v0 }
  0x32   :  { %387 = vmatpush2.bf16.msra.mxu1 %v1052_v32 }
  0x33   :  { %388 = vmatprep.subr.bf16.mxu1 %v1069_v0 }
  0x36   :  { %389 = vmatpush2.bf16.msra.mxu1 %v1053_v33 }
  0x37   :  { %663 = vmatprep.subr.bf16.mxu1 %v1069_v0 }
  0x39   :  { %391 = vmatmul.mubr.bf16.vlgmr.msra.gmra.mxu1 %v1054_v34 }
  0x3a   :  { %664 = vmatpush1.bf16.msra.mxu1 %v1126_v1 }
  0x3b   :  { %665 = vmatprep.subr.bf16.mxu1 %v1069_v0 }
  0x3e   :  { %666 = vmatpush1.bf16.msra.mxu1 %v1132_v2 }
  0x3f   :  { %667 = vmatprep.subr.bf16.mxu1 %v1069_v0 }
  0x42   :  { %668 = vmatpush1.bf16.msra.mxu1 %v1148_v5  ;;  %v1384_v5 = vld [vmem:[%s1479_s7 + $0x8] sm:$0xff]  }
  0x43   :  { %669 = vmatprep.subr.bf16.mxu1 %v1069_v0 }
  0x46   :  { %670 = vmatpush1.bf16.msra.mxu1 %v1167_v8  ;;  %v1391_v8 = vld [vmem:[%s1479_s7] sm:$0xff]  }
  0x47   :  { %671 = vmatprep.subr.bf16.mxu1 %v1069_v0 }
  0x4a   :  { %672 = vmatpush1.bf16.msra.mxu1 %v1192_v12  ;;  %v1066_v12 = vld [vmem:[%s1474_s0 + $0x2c] ss:$16 sps:$4 sm:$0xff]  }
  0x4b   :  { %673 = vmatprep.subr.bf16.mxu1 %v1069_v0  ;;  %904 = vmatprep.mubr.msk.bf16.mxu1 %vm313_vm0, %v1066_v12 }
  0x4e   :  { %674 = vmatpush1.bf16.msra.mxu1 %v1211_v15  ;;  %v1068_v15 = vld [vmem:[%s1474_s0 + $0x28] ss:$16 sps:$4 sm:$0xff]  }
  0x4f   :  { %675 = vmatprep.subr.bf16.mxu1 %v1069_v0 }
  0x52   :  { %676 = vmatpush1.bf16.msra.mxu1 %v1035_v18  ;;  %v1405_v18 = vld [vmem:[%s1480_s6] ss:$0 sm:$0xff] }
  0x53   :  { %677 = vmatprep.subr.bf16.mxu1 %v1069_v0 }
  0x56   :  { %678 = vmatpush1.bf16.msra.mxu1 %v1038_v21 }
  0x57   :  { %683 = vmatprep.subr.bf16.mxu1 %v1069_v0 }
  0x5a   :  { %684 = vmatpush2.bf16.msra.mxu1 %v1041_v25 }
  0x5b   :  { %685 = vmatprep.subr.bf16.mxu1 %v1069_v0 }
  0x5e   :  { %686 = vmatpush2.bf16.msra.mxu1 %v1044_v29 }
  0x5f   :  { %687 = vmatprep.subr.bf16.mxu1 %v1069_v0 }
  0x62   :  { %688 = vmatpush2.bf16.msra.mxu1 %v1047_v30 }
  0x63   :  { %689 = vmatprep.subr.bf16.mxu1 %v1069_v0 }
  0x66   :  { %690 = vmatpush2.bf16.msra.mxu1 %v1051_v31  ;;  %v1065_v31 = vld [vmem:[%s1474_s0 + $0x24] ss:$16 sps:$4 sm:$0xff]  }
  0x67   :  { %691 = vmatprep.subr.bf16.mxu1 %v1069_v0 }
  0x6a   :  { %692 = vmatpush2.bf16.msra.mxu1 %v1052_v32 }
  0x6b   :  { %693 = vmatprep.subr.bf16.mxu1 %v1069_v0 }
  0x6e   :  { %694 = vmatpush2.bf16.msra.mxu1 %v1053_v33 }
  0x71   :  { %696 = vmatmul.mubr.bf16.vlgmr.msra.gmra.mxu1 %v1068_v15 }
  0xe3   :  { %v924_v38 = vpop.f32.mrf.mxu0 }
  0xe5   :  { %v925_v39 = vpop.f32.mrf.mxu0 }
  0xe6   :  { %v926_v42 = vadd.f32 %v925_v39, %v924_v38 }
  0xe7   :  { %v927_v40 = vpop.f32.mrf.mxu0 }
  0xe8   :  { %v352_v48 = vadd.f32 %v926_v42, %v1345_v44 }
  0xe9   :  { %v928_v41 = vpop.f32.mrf.mxu0 }
  0xea   :  { %v929_v43 = vadd.f32 %v928_v41, %v927_v40 }
  0xec   :  { %v355_v49 = vadd.f32 %v929_v43, %v1350_v46 }
  0xf9   :  { %v392_v45 = vpop.f32.mrf.mxu1 }
  0xfa   :  { %v393_v51 = vadd.f32 %v392_v45, %v352_v48 }
  0xfb   :  { %v394_v47 = vpop.f32.mrf.mxu1 }
  0xfd   :  { %v395_v50 = vpop.f32.mrf.mxu1 }
  0xfe   :  { %v396_v52 = vadd.f32 %v395_v50, %v355_v49 }
  0xff   :  { %v397_v53 = vpop.f32.mrf.mxu1 }
 0x100   :  { %v399_v54 = vpack.c.bf16 %v396_v52, %v393_v51 }
 0x102   :  { %975 = vmatmul.mubr.msk.bf16.vlgmr.msra.gmra.mxu0 %vm418_vm2, %v399_v54 }
 0x103   :  { %982 = vmatprep.mubr.msk.bf16.mxu0 %vm1071_vm1, %v1070_v36  ;;  %979 = vmatpush3.bf16.msra.mxu0 %v1360_v55 }
 0x104   :  { %980 = vmatprep.subr.bf16.mxu0 %v1070_v36 }
 0x107   :  { %981 = vmatpush3.bf16.msra.mxu0 %v1367_v56 }
 0x108   :  { %986 = vmatprep.subr.bf16.mxu0 %v1070_v36 }
 0x1c2   :  { %v456_v58 = vpop.f32.mrf.mxu0 }
 0x1c3   :  { %v457_v60 = vadd.f32 %v1374_v57, %v456_v58 }
 0x1c4   :  { %v976_v59 = vpop.f32.mrf.mxu0 }
 0x1c5   :  { %v463_v0 = vmax.f32 %v457_v60, 0.0 }
 0x1c6   :  { %v459_v61 = vpop.f32.mrf.mxu0 }
 0x1c7   :  { %v460_v62 = vadd.f32 %v1374_v57, %v459_v61 }
 0x1c8   :  { %v977_v63 = vpop.f32.mrf.mxu0 }
 0x1c9   :  { %v464_v1 = vmax.f32 %v460_v62, 0.0 }
 0x1cb   :  { %v465_v2 = vpack.c.bf16 %v464_v1, %v463_v0 }
 0x1cd   :  { %983 = vmatmul.mubr.msk.bf16.vlgmr.msra.gmra.mxu0 %vm418_vm2, %v465_v2 }
 0x1ce   :  { %990 = vmatprep.mubr.msk.bf16.mxu0 %vm1071_vm1, %v1070_v36  ;;  %987 = vmatpush3.bf16.msra.mxu0 %v1384_v5 }
 0x1cf   :  { %988 = vmatprep.subr.bf16.mxu0 %v1070_v36 }
 0x1d2   :  { %989 = vmatpush3.bf16.msra.mxu0 %v1391_v8 }
 0x1d3   :  { %939 = vmatprep.subr.bf16.mxu0 %v1138_v3 }
 0x28d   :  { %v521_v21 = vpop.f32.mrf.mxu0 }
 0x28e   :  { %v522_v3 = vadd.f32 %v1405_v18, %v521_v21 }
 0x28f   :  { %v984_v24 = vpop.f32.mrf.mxu0 }
 0x290   :  { %v528_v29 = vmax.f32 %v522_v3, 0.0 }
 0x291   :  { %v524_v25 = vpop.f32.mrf.mxu0 }
 0x292   :  { %v525_v27 = vadd.f32 %v1405_v18, %v524_v25 }
 0x293   :  { %v985_v28 = vpop.f32.mrf.mxu0 }
 0x294   :  { %v529_v30 = vmax.f32 %v525_v27, 0.0 }
 0x296   :  { %v530_v32 = vpack.c.bf16 %v529_v30, %v528_v29 }
 0x298   :  { %991 = vmatmul.mubr.msk.bf16.vlgmr.msra.gmra.mxu0 %vm418_vm2, %v530_v32 }
 0x299   :  { %940 = vmatpush3.bf16.msra.mxu0 %v1143_v4  ;;  %654 = vmatprep.mubr.bf16.mxu0 %v1065_v31  ;;  %v1063_v4 = vld [vmem:[%s1474_s0 + $0x20] ss:$16 sps:$4 sm:$0xff]  }
 0x29a   :  { %941 = vmatprep.subr.bf16.mxu0 %v1156_v6  ;;  %v697_v6 = vpop.f32.mrf.mxu1 }
 0x29d   :  { %942 = vmatpush3.bf16.msra.mxu0 %v1162_v7  ;;  %v699_v7 = vpop.f32.mrf.mxu1 }
 0x29e   :  { %943 = vmatprep.subr.bf16.mxu0 %v1173_v9 }
 0x29f   :  { %v700_v9 = vpop.f32.mrf.mxu1 }
 0x2a1   :  { %944 = vmatpush3.bf16.msra.mxu0 %v1180_v10  ;;  %v702_v10 = vpop.f32.mrf.mxu1 }
 0x2a2   :  { %945 = vmatprep.subr.bf16.mxu0 %v1187_v11  ;;  %v892_v11 = vld [vmem:[%s1481_s8] ss:$0 sm:$0xff] }
 0x2a5   :  { %946 = vmatpush3.bf16.msra.mxu0 %v1199_v13 }
 0x2a6   :  { %947 = vmatprep.subr.bf16.mxu0 %v1206_v14 }
 0x2a9   :  { %948 = vmatpush3.bf16.msra.mxu0 %v1218_v16 }
 0x2aa   :  { %949 = vmatprep.subr.bf16.mxu0 %v1225_v17 }
 0x2ad   :  { %950 = vmatpush3.bf16.msra.mxu0 %v1235_v19 }
 0x2ae   :  { %951 = vmatprep.subr.bf16.mxu0 %v1242_v20 }
 0x2b1   :  { %952 = vmatpush3.bf16.msra.mxu0 %v1251_v22 }
 0x2b2   :  { %953 = vmatprep.subr.bf16.mxu0 %v1258_v23 }
 0x2b5   :  { %954 = vmatpush3.bf16.msra.mxu0 %v1270_v26 }
 0x2b6   :  { %994 = vmatprep.subr.bf16.mxu0 %v1070_v36 }
 0x2b8   :  { %655 = vmatmul.mubr.bf16.vlgmr.msra.gmra.mxu0 %v1063_v4 }
 0x2b9   :  { %995 = vmatpush3.bf16.msra.mxu0 %v1328_v35  ;;  %998 = vmatprep.mubr.msk.bf16.mxu0 %vm1071_vm1, %v1070_v36 }
 0x2ba   :  { %996 = vmatprep.subr.bf16.mxu0 %v1070_v36 }
 0x2bd   :  { %997 = vmatpush3.bf16.msra.mxu0 %v1336_v37 }
 0x2be   :  { %1002 = vmatprep.subr.bf16.mxu0 %v1070_v36 }
 0x358   :  { %v586_v13 = vpop.f32.mrf.mxu0 }
 0x359   :  { %v587_v14 = vadd.f32 %v892_v11, %v586_v13 }
 0x35a   :  { %v992_v16 = vpop.f32.mrf.mxu0 }
 0x35b   :  { %593 = vst [vmem:[%s1482_s9] sm:$0xff] %v587_v14 }
 0x35c   :  { %v589_v17 = vpop.f32.mrf.mxu0 }
 0x35d   :  { %v590_v19 = vadd.f32 %v892_v11, %v589_v17 }
 0x35e   :  { %v993_v20 = vpop.f32.mrf.mxu0 }
 0x35f   :  { %594 = vst [vmem:[%s1482_s9 + $0x10] sm:$0xff] %v590_v19 }
 0x378   :  { %v955_v22 = vpop.f32.mrf.mxu0 }
 0x37a   :  { %v956_v23 = vpop.f32.mrf.mxu0 }
 0x37b   :  { %v957_v26 = vadd.f32 %v956_v23, %v955_v22 }
 0x37c   :  { %v958_v33 = vpop.f32.mrf.mxu0 }
 0x37d   :  { %v657_v35 = vadd.f32 %v957_v26, %v1345_v44 }
 0x37e   :  { %v959_v34 = vpop.f32.mrf.mxu0 }
 0x37f   :  { %v960_v37 = vadd.f32 %v959_v34, %v958_v33  ;;  %v698_v39 = vadd.f32 %v697_v6, %v657_v35 }
 0x381   :  { %v660_v38 = vadd.f32 %v960_v37, %v1350_v46 }
 0x383   :  { %v701_v40 = vadd.f32 %v700_v9, %v660_v38 }
 0x385   :  { %v704_v41 = vpack.c.bf16 %v701_v40, %v698_v39 }
 0x387   :  { %999 = vmatmul.mubr.msk.bf16.vlgmr.msra.gmra.mxu0 %vm418_vm2, %v704_v41 }
 0x388   :  { %1003 = vmatpush3.bf16.msra.mxu0 %v1360_v55  ;;  %1006 = vmatprep.mubr.msk.bf16.mxu0 %vm1071_vm1, %v1070_v36 }
 0x389   :  { %1004 = vmatprep.subr.bf16.mxu0 %v1070_v36 }
 0x38c   :  { %1005 = vmatpush3.bf16.msra.mxu0 %v1367_v56 }
 0x38d   :  { %1010 = vmatprep.subr.bf16.mxu0 %v1070_v36 }
 0x447   :  { %v742_v42 = vpop.f32.mrf.mxu0 }
 0x448   :  { %v743_v44 = vadd.f32 %v1374_v57, %v742_v42 }
 0x449   :  { %v1000_v43 = vpop.f32.mrf.mxu0 }
 0x44a   :  { %v749_v48 = vmax.f32 %v743_v44, 0.0 }
 0x44b   :  { %v745_v45 = vpop.f32.mrf.mxu0 }
 0x44c   :  { %v746_v46 = vadd.f32 %v1374_v57, %v745_v45 }
 0x44d   :  { %v1001_v47 = vpop.f32.mrf.mxu0 }
 0x44e   :  { %v750_v49 = vmax.f32 %v746_v46, 0.0 }
 0x450   :  { %v751_v50 = vpack.c.bf16 %v750_v49, %v749_v48 }
 0x452   :  { %1007 = vmatmul.mubr.msk.bf16.vlgmr.msra.gmra.mxu0 %vm418_vm2, %v751_v50 }
 0x453   :  { %1011 = vmatpush3.bf16.msra.mxu0 %v1384_v5  ;;  %1014 = vmatprep.mubr.msk.bf16.mxu0 %vm1071_vm1, %v1070_v36 }
 0x454   :  { %1012 = vmatprep.subr.bf16.mxu0 %v1070_v36 }
 0x457   :  { %1013 = vmatpush3.bf16.msra.mxu0 %v1391_v8 }
 0x512   :  { %v789_v51 = vpop.f32.mrf.mxu0 }
 0x513   :  { %v790_v53 = vadd.f32 %v1405_v18, %v789_v51 }
 0x514   :  { %v1008_v52 = vpop.f32.mrf.mxu0 }
 0x515   :  { %v796_v57 = vmax.f32 %v790_v53, 0.0 }
 0x516   :  { %v792_v54 = vpop.f32.mrf.mxu0 }
 0x517   :  { %v793_v55 = vadd.f32 %v1405_v18, %v792_v54 }
 0x518   :  { %v1009_v56 = vpop.f32.mrf.mxu0 }
 0x519   :  { %v797_v58 = vmax.f32 %v793_v55, 0.0 }
 0x51b   :  { %v798_v59 = vpack.c.bf16 %v797_v58, %v796_v57 }
 0x51d   :  { %1015 = vmatmul.mubr.msk.bf16.vlgmr.msra.gmra.mxu0 %vm418_vm2, %v798_v59 }
 0x5dd   :  { %v836_v60 = vpop.f32.mrf.mxu0 }
 0x5de   :  { %v837_v61 = vadd.f32 %v892_v11, %v836_v60 }
 0x5df   :  { %v1016_v62 = vpop.f32.mrf.mxu0 }
 0x5e0   :  { %843 = vst [vmem:[%s1482_s9 + $0x8] sm:$0xff] %v837_v61 }
 0x5e1   :  { %v839_v36 = vpop.f32.mrf.mxu0 }
 0x5e2   :  { %v840_v63 = vadd.f32 %v892_v11, %v839_v36 }
 0x5e3   :  { %v1017_v0 = vpop.f32.mrf.mxu0 }
 0x5e4   :  { %844 = vst [vmem:[%s1482_s9 + $0x18] sm:$0xff] %v840_v63 }

</bundles_post_ra>
